<compile_context>
chip_gen: v6e
topology: v6e:2x2x1
jax: 0.10.0
libtpu: 0.0.40
codegen_flags: <defaults>
</compile_context>

<pallas_src>
import functools
import math

import jax
import jax.numpy as jnp
from jax.experimental import pallas as pl
from jax.experimental.pallas import tpu as pltpu

_MIB = 1024 * 1024


def _pick_tile(dim, preferred, align):
    """Full dim if it fits, else an `align`-multiple tile (ragged tail is masked)."""
    if dim <= preferred:
        return dim
    return max(align, (preferred // align) * align)


def _per_class_kernel(emb_ref, w_ref, v0_ref, v1_ref, *, margin, scale, e_chunk):
    """Per-class pass: chunked E reduction, 2 transcendentals per class.

    Blocks: emb/w (TC, E) native dtype -> v0/v1 (TC, 1) f32 columns.
    """
    tc = emb_ref.shape[0]
    E = emb_ref.shape[1]
    n_full = E // e_chunk
    tail = E - n_full * e_chunk

    def acc_chunk(dot, ee, ww, e, w):
        e = e.astype(jnp.float32)
        w = w.astype(jnp.float32)
        dot = dot + jnp.sum(e * w, axis=1, keepdims=True)
        ee = ee + jnp.sum(e * e, axis=1, keepdims=True)
        ww = ww + jnp.sum(w * w, axis=1, keepdims=True)
        return dot, ee, ww

    zero = jnp.zeros((tc, 1), jnp.float32)
    dot, ee, ww = zero, zero, zero

    if n_full >= 2:
        # Chunked reduction: bounds live f32 state to one (TC, e_chunk) chunk.
        def body(i, carry):
            start = pl.multiple_of(i * e_chunk, e_chunk)
            return acc_chunk(*carry,
                             emb_ref[:, pl.ds(start, e_chunk)],
                             w_ref[:, pl.ds(start, e_chunk)])
        dot, ee, ww = jax.lax.fori_loop(0, n_full, body, (dot, ee, ww))
    elif n_full == 1:
        dot, ee, ww = acc_chunk(dot, ee, ww, emb_ref[:, :e_chunk], w_ref[:, :e_chunk])
    if tail:
        dot, ee, ww = acc_chunk(dot, ee, ww,
                                emb_ref[:, n_full * e_chunk:],
                                w_ref[:, n_full * e_chunk:])

    # cos_sim = <e, w> / (||e|| * ||w||) via rsqrt; eps matches F.normalize(1e-12).
    inv_e = jax.lax.rsqrt(jnp.maximum(ee, 1e-24))
    inv_w = jax.lax.rsqrt(jnp.maximum(ww, 1e-24))
    cos_sim = dot * inv_e * inv_w                            # (TC, 1)

    # theta = acos(clamp(cos_sim)) handled analytically:
    #   cos(theta) = c, sin(theta) = sqrt(1 - c^2)
    c = jnp.minimum(jnp.maximum(cos_sim, -1.0 + 1e-7), 1.0 - 1e-7)
    sin_t = jnp.sqrt(1.0 - c * c)

    # delta takes exactly two values per class (cos_sim UNclamped, as in torch):
    #   d0 = -margin*cos_sim          (one_hot == 0)
    #   d1 = margin*(1 - cos_sim)     (one_hot == 1)  ==  d0 + margin
    d0 = -margin * cos_sim
    cos_d0 = jnp.cos(d0)
    sin_d0 = jnp.sin(d0)
    cos_m = math.cos(margin)                                 # compile-time constants
    sin_m = math.sin(margin)
    cos_d1 = cos_d0 * cos_m - sin_d0 * sin_m
    sin_d1 = sin_d0 * cos_m + cos_d0 * sin_m

    v0_ref[...] = scale * (c * cos_d0 - sin_t * sin_d0)
    v1_ref[...] = scale * (c * cos_d1 - sin_t * sin_d1)


def _select_kernel(tgt_ref, v0_ref, v1_ref, out_ref, *, col_grid_axis):
    """Streaming pass: out[i, j] = (targets[i] == j) ? v1[j] : v0[j], (B, C) layout."""
    tb, tc = out_ref.shape
    col0 = 0 if col_grid_axis is None else pl.program_id(col_grid_axis) * tc
    cls = col0 + jax.lax.broadcasted_iota(jnp.int32, (tb, tc), 1)
    one_hot = cls == tgt_ref[...]                            # (TB, 1) -> (TB, TC)
    # (1, TC) rows broadcast over sublanes; pure VPU select, lane-dense store.
    out_ref[...] = jnp.where(one_hot, v1_ref[...], v0_ref[...]).astype(out_ref.dtype)


def arcface_logits(embeddings, weight, targets, *, margin=0.5, scale=64.0,
                   out_dtype=jnp.float32):
    B, E = embeddings.shape
    C, E2 = weight.shape
    assert E == E2
    # The PyTorch forward's broadcasting is only well-defined when B == C.
    assert B == C, "ArcFaceLoss.forward requires batch == num_classes to broadcast"

    in_itemsize = max(jnp.dtype(embeddings.dtype).itemsize,
                      jnp.dtype(weight.dtype).itemsize)

    # ---- Pass 1: per-class v0/v1 columns --------------------------------------
    # VMEM-budget-aware class tile: 2 inputs x 2 buffers x (tc_a, E) at native dtype
    # plus in-kernel f32 chunk temporaries must stay well under the scoped limit
    # on every generation (16 MiB default on v5e, 64 MiB physical on v7x).
    e_chunk = min(E, 512)
    pass1_input_budget = 16 * _MIB
    tc_a = pass1_input_budget // max(1, 4 * E * in_itemsize)
    tc_a = max(8, min(1024, (tc_a // 8) * 8))
    if C <= tc_a:
        tc_a = C

    p1_bytes = (4 * tc_a * E * in_itemsize          # double-buffered inputs (x2 arrays)
                + 8 * tc_a * 4                      # double-buffered (TC,1) outputs x2
                + 8 * tc_a * e_chunk * 4)           # in-kernel f32 chunk temporaries
    p1_limit = min(48 * _MIB, max(32 * _MIB, int(p1_bytes * 1.25)))

    kernel_a = functools.partial(_per_class_kernel, margin=margin, scale=scale,
                                 e_chunk=e_chunk)
    v0_col, v1_col = pl.pallas_call(
        kernel_a,
        out_shape=(jax.ShapeDtypeStruct((C, 1), jnp.float32),
                   jax.ShapeDtypeStruct((C, 1), jnp.float32)),
        grid=(pl.cdiv(C, tc_a),),
        in_specs=[pl.BlockSpec((tc_a, E), lambda j: (j, 0)),   # embeddings rows (diag)
                  pl.BlockSpec((tc_a, E), lambda j: (j, 0))],  # weight rows
        out_specs=(pl.BlockSpec((tc_a, 1), lambda j: (j, 0)),
                   pl.BlockSpec((tc_a, 1), lambda j: (j, 0))),
        compiler_params=pltpu.CompilerParams(
            dimension_semantics=("parallel",),
            vmem_limit_bytes=p1_limit),
    )(embeddings, weight)

    # (C, 1) -> (1, C): identical row-major linearization => free reshape, no transpose.
    v0_row = v0_col.reshape(1, C)
    v1_row = v1_col.reshape(1, C)
    tgt_col = targets.astype(jnp.int32).reshape(B, 1)

    # ---- Pass 2: stream the (B, C) logits, C on the lane axis ------------------
    out_itemsize = jnp.dtype(out_dtype).itemsize
    row_bytes = C * out_itemsize
    target_block = 4 * _MIB      # ~4 MiB output blocks amortize the ~0.35us/step cost

    if row_bytes <= _MIB:
        # Full-C blocks, 1-D grid over B: v0/v1 fetched once and resident,
        # fewest grid steps, maximally lane-dense unmasked stores.
        tb_cap = max(8, (target_block // row_bytes) // 8 * 8)
        tb = B if B <= tb_cap else tb_cap
        tc = C
        grid = (pl.cdiv(B, tb),)
        kernel_b = functools.partial(_select_kernel, col_grid_axis=None)
        in_specs = [pl.BlockSpec((tb, 1), lambda i: (i, 0)),   # targets column
                    pl.BlockSpec((1, C), lambda i: (0, 0)),    # v0 row (resident)
                    pl.BlockSpec((1, C), lambda i: (0, 0))]    # v1 row (resident)
        out_specs = pl.BlockSpec((tb, C), lambda i: (i, 0))
        semantics = ("parallel",)
    else:
        # Very large C fallback: 2-D grid, wide lane tiles (~4 MiB output blocks).
        tb = _pick_tile(B, 256, 8)
        tc = _pick_tile(C, 4096, 128)
        grid = (pl.cdiv(B, tb), pl.cdiv(C, tc))
        kernel_b = functools.partial(_select_kernel, col_grid_axis=1)
        in_specs = [pl.BlockSpec((tb, 1), lambda i, j: (i, 0)),
                    pl.BlockSpec((1, tc), lambda i, j: (0, j)),
                    pl.BlockSpec((1, tc), lambda i, j: (0, j))]
        out_specs = pl.BlockSpec((tb, tc), lambda i, j: (i, j))
        semantics = ("parallel", "parallel")

    p2_bytes = (2 * tb * tc * out_itemsize          # double-buffered output blocks
                + 4 * tc * 4                        # v0/v1 row blocks (x2 buffers)
                + 4 * tb * 4)                       # targets column
    p2_limit = min(48 * _MIB, max(32 * _MIB, int(p2_bytes * 1.5)))

    out = pl.pallas_call(
        kernel_b,
        out_shape=jax.ShapeDtypeStruct((B, C), out_dtype),
        grid=grid,
        in_specs=in_specs,
        out_specs=out_specs,
        compiler_params=pltpu.CompilerParams(
            dimension_semantics=semantics,
            vmem_limit_bytes=p2_limit),
    )(tgt_col, v0_row, v1_row)
    return out  # (B, C), PyTorch output layout — no wrapper transpose


def arcface_ref(embeddings, weight, targets, *, margin=0.5, scale=64.0):
    """Pure-JAX reference mirroring the PyTorch forward (incl. its broadcasting)."""
    ne = embeddings / jnp.maximum(
        jnp.linalg.norm(embeddings, axis=1, keepdims=True), 1e-12)
    nw = weight / jnp.maximum(
        jnp.linalg.norm(weight, axis=1, keepdims=True), 1e-12)
    n1 = jnp.linalg.norm(ne, axis=1)
    n2 = jnp.linalg.norm(nw, axis=1)
    cos_sim = jnp.sum(ne * nw, axis=1) / (jnp.maximum(n1, 1e-6) * jnp.maximum(n2, 1e-6))
    theta = jnp.arccos(jnp.clip(cos_sim, -1.0 + 1e-7, 1.0 - 1e-7))
    one_hot = jax.nn.one_hot(targets, weight.shape[0], dtype=jnp.float32)
    return scale * jnp.cos(theta[None, :] + margin * (one_hot - cos_sim[None, :]))


if __name__ == "__main__":
    embedding_size = 32
    num_classes = 8
    batch = num_classes  # required by the reference forward's broadcasting
    margin, scale = 0.5, 64.0

    key = jax.random.PRNGKey(0)
    k_emb, k_w, k_tgt = jax.random.split(key, 3)

    embeddings = jax.random.normal(k_emb, (batch, embedding_size), dtype=jnp.float32)
    # nn.init.xavier_uniform_ on (num_classes, embedding_size):
    bound = (6.0 / (num_classes + embedding_size)) ** 0.5
    weight = jax.random.uniform(
        k_w, (num_classes, embedding_size), dtype=jnp.float32,
        minval=-bound, maxval=bound)
    targets = jax.random.randint(k_tgt, (batch,), 0, num_classes, dtype=jnp.int32)

    logits = arcface_logits(embeddings, weight, targets, margin=margin, scale=scale)
    logits = jax.block_until_ready(logits)

    expected = arcface_ref(embeddings, weight, targets, margin=margin, scale=scale)
    assert logits.shape == (batch, num_classes)
    assert jnp.allclose(logits, expected, atol=5e-3, rtol=1e-4), (
        float(jnp.max(jnp.abs(logits - expected))))

    print("KERNEL_OK")
</pallas_src>

<mosaic_0001>
module attributes {stable_mosaic.version = 11 : i64} {
  func.func @_per_class_kernel(%arg0: i32, %arg1: memref<8x32xf32, #tpu.memory_space<vmem>>, %arg2: memref<8x32xf32, #tpu.memory_space<vmem>>, %arg3: memref<8x1xf32, #tpu.memory_space<vmem>>, %arg4: memref<8x1xf32, #tpu.memory_space<vmem>>) attributes {dimension_semantics = [#tpu.dimension_semantics<parallel>], iteration_bounds = array<i64: 1>, scalar_prefetch = 0 : i64, scratch_operands = 0 : i64, tpu.core_type = #tpu.core_type<tc>, window_params = [{transform_indices = @transform_0, window_bounds = array<i64: 8, 32>}, {transform_indices = @transform_1, window_bounds = array<i64: 8, 32>}, {transform_indices = @transform_2, window_bounds = array<i64: 8, 1>}, {transform_indices = @transform_3, window_bounds = array<i64: 8, 1>}]} {
    %cst = arith.constant 0.000000e+00 : f32
    %0 = vector.broadcast %cst : f32 to vector<8x1xf32>
    %c0 = arith.constant 0 : index
    %c0_0 = arith.constant 0 : index
    %1 = vector.load %arg1[%c0, %c0_0] : memref<8x32xf32, #tpu.memory_space<vmem>>, vector<8x32xf32>
    %c0_1 = arith.constant 0 : index
    %c0_2 = arith.constant 0 : index
    %2 = vector.load %arg2[%c0_1, %c0_2] : memref<8x32xf32, #tpu.memory_space<vmem>>, vector<8x32xf32>
    %3 = arith.mulf %1, %2 : vector<8x32xf32>
    %cst_3 = arith.constant dense<0.000000e+00> : vector<8xf32>
    %4 = vector.multi_reduction <add>, %3, %cst_3 [1] : vector<8x32xf32> to vector<8xf32>
    %5 = vector.shape_cast %4 : vector<8xf32> to vector<8x1xf32>
    %6 = arith.addf %0, %5 : vector<8x1xf32>
    %7 = arith.mulf %1, %1 : vector<8x32xf32>
    %cst_4 = arith.constant dense<0.000000e+00> : vector<8xf32>
    %8 = vector.multi_reduction <add>, %7, %cst_4 [1] : vector<8x32xf32> to vector<8xf32>
    %9 = vector.shape_cast %8 : vector<8xf32> to vector<8x1xf32>
    %10 = arith.addf %0, %9 : vector<8x1xf32>
    %11 = arith.mulf %2, %2 : vector<8x32xf32>
    %cst_5 = arith.constant dense<0.000000e+00> : vector<8xf32>
    %12 = vector.multi_reduction <add>, %11, %cst_5 [1] : vector<8x32xf32> to vector<8xf32>
    %13 = vector.shape_cast %12 : vector<8xf32> to vector<8x1xf32>
    %14 = arith.addf %0, %13 : vector<8x1xf32>
    %cst_6 = arith.constant 1.000000e-24 : f32
    %15 = vector.broadcast %cst_6 : f32 to vector<8x1xf32>
    %16 = arith.maximumf %10, %15 : vector<8x1xf32>
    %17 = math.rsqrt %16 : vector<8x1xf32>
    %cst_7 = arith.constant 1.000000e-24 : f32
    %18 = vector.broadcast %cst_7 : f32 to vector<8x1xf32>
    %19 = arith.maximumf %14, %18 : vector<8x1xf32>
    %20 = math.rsqrt %19 : vector<8x1xf32>
    %21 = arith.mulf %6, %17 : vector<8x1xf32>
    %22 = arith.mulf %21, %20 : vector<8x1xf32>
    %cst_8 = arith.constant -0.99999988 : f32
    %23 = vector.broadcast %cst_8 : f32 to vector<8x1xf32>
    %24 = arith.maximumf %22, %23 : vector<8x1xf32>
    %cst_9 = arith.constant 0.99999988 : f32
    %25 = vector.broadcast %cst_9 : f32 to vector<8x1xf32>
    %26 = arith.minimumf %24, %25 : vector<8x1xf32>
    %27 = arith.mulf %26, %26 : vector<8x1xf32>
    %cst_10 = arith.constant 1.000000e+00 : f32
    %28 = vector.broadcast %cst_10 : f32 to vector<8x1xf32>
    %29 = arith.subf %28, %27 : vector<8x1xf32>
    %30 = math.sqrt %29 : vector<8x1xf32>
    %cst_11 = arith.constant -5.000000e-01 : f32
    %31 = vector.broadcast %cst_11 : f32 to vector<8x1xf32>
    %32 = arith.mulf %31, %22 : vector<8x1xf32>
    %33 = math.cos %32 : vector<8x1xf32>
    %34 = math.sin %32 : vector<8x1xf32>
    %cst_12 = arith.constant 0.87758255 : f32
    %35 = vector.broadcast %cst_12 : f32 to vector<8x1xf32>
    %36 = arith.mulf %33, %35 : vector<8x1xf32>
    %cst_13 = arith.constant 0.47942555 : f32
    %37 = vector.broadcast %cst_13 : f32 to vector<8x1xf32>
    %38 = arith.mulf %34, %37 : vector<8x1xf32>
    %39 = arith.subf %36, %38 : vector<8x1xf32>
    %cst_14 = arith.constant 0.87758255 : f32
    %40 = vector.broadcast %cst_14 : f32 to vector<8x1xf32>
    %41 = arith.mulf %34, %40 : vector<8x1xf32>
    %cst_15 = arith.constant 0.47942555 : f32
    %42 = vector.broadcast %cst_15 : f32 to vector<8x1xf32>
    %43 = arith.mulf %33, %42 : vector<8x1xf32>
    %44 = arith.addf %41, %43 : vector<8x1xf32>
    %45 = arith.mulf %26, %33 : vector<8x1xf32>
    %46 = arith.mulf %30, %34 : vector<8x1xf32>
    %47 = arith.subf %45, %46 : vector<8x1xf32>
    %cst_16 = arith.constant 6.400000e+01 : f32
    %48 = vector.broadcast %cst_16 : f32 to vector<8x1xf32>
    %49 = arith.mulf %48, %47 : vector<8x1xf32>
    %c0_17 = arith.constant 0 : index
    %c0_18 = arith.constant 0 : index
    %50 = vector.load %arg3[%c0_17, %c0_18] : memref<8x1xf32, #tpu.memory_space<vmem>>, vector<8x1xf32>
    tpu.vector_store %arg3[%c0_17, %c0_18], %49 {strides = array<i32>} : memref<8x1xf32, #tpu.memory_space<vmem>>, vector<8x1xf32>,
    %51 = arith.mulf %26, %39 : vector<8x1xf32>
    %52 = arith.mulf %30, %44 : vector<8x1xf32>
    %53 = arith.subf %51, %52 : vector<8x1xf32>
    %cst_19 = arith.constant 6.400000e+01 : f32
    %54 = vector.broadcast %cst_19 : f32 to vector<8x1xf32>
    %55 = arith.mulf %54, %53 : vector<8x1xf32>
    %c0_20 = arith.constant 0 : index
    %c0_21 = arith.constant 0 : index
    %56 = vector.load %arg4[%c0_20, %c0_21] : memref<8x1xf32, #tpu.memory_space<vmem>>, vector<8x1xf32>
    tpu.vector_store %arg4[%c0_20, %c0_21], %55 {strides = array<i32>} : memref<8x1xf32, #tpu.memory_space<vmem>>, vector<8x1xf32>,
    return
  }
  func.func @transform_0(%arg0: i32) -> (i32, i32) {
    %c0_i32 = arith.constant 0 : i32
    %c0_i32_0 = arith.constant 0 : i32
    return %arg0, %c0_i32 : i32, i32
  }
  func.func @transform_1(%arg0: i32) -> (i32, i32) {
    %c0_i32 = arith.constant 0 : i32
    %c0_i32_0 = arith.constant 0 : i32
    return %arg0, %c0_i32 : i32, i32
  }
  func.func @transform_2(%arg0: i32) -> (i32, i32) {
    %c0_i32 = arith.constant 0 : i32
    %c0_i32_0 = arith.constant 0 : i32
    return %arg0, %c0_i32 : i32, i32
  }
  func.func @transform_3(%arg0: i32) -> (i32, i32) {
    %c0_i32 = arith.constant 0 : i32
    %c0_i32_0 = arith.constant 0 : i32
    return %arg0, %c0_i32 : i32, i32
  }
}

</mosaic_0001>

<bundles_post_ra>
// kernel: tpu_custom_call.1
= control target key start
LH: loop header
LB: loop body
LE: loop exit
PB: predicated region body
PF: predicated region fallthrough
CT: control target
= control target key end

     0   :  { %9 = vsyncpa [#allocation3], 0  ;;  %s453_s0 = inlined_call_operand.hbm [shape: f32[8,32], index: 0, kind: input, shape index: {}]   ;;  %s454_s1 = inlined_call_operand.hbm [shape: f32[8,32], index: 1, kind: input, shape index: {}]   ;;  %s455_s2 = inlined_call_operand.vmem [shape: f32[8,1], index: 2, kind: output, shape index: {0}]   ;;  %s456_s3 = inlined_call_operand.vmem [shape: f32[8,1], index: 3, kind: output, shape index: {1}]  }
   0x1   :  { %10 = vsyncpa [#allocation5], 0  ;;  %s382_s12 = smov [#allocation2]   ;;  %s383_s14 = smov [#allocation4]  }
   0x2   :  { %s17_s13 = sshll.u32 %s382_s12, 4  ;;  %s27_s15 = sshll.u32 %s383_s14, 4  ;;  %s18_s13 = int_to_ptr.vmem [resolvable:$true] %s17_s13  ;;  %s28_s15 = int_to_ptr.vmem [resolvable:$true] %s27_s15 }
   0x3   :  { %s346_s16 = scalar_lea.vmem %s18_s13, 128  ;;  %p351_p1 = scmp.lt.s32.totalorder %s18_s13, %s18_s13 }
   0x4   :  { %p347_p0 = scmp.ne.s32.totalorder %s18_s13, %s346_s16  ;;  %p352_p2 = scmp.lt.s32.totalorder %s346_s16, %s346_s16 }
   0x6   :  { %p353_p3 = por %p352_p2, %p351_p1 }
   0x8   :  { %p354_p4 = pnand %p353_p3, %p347_p0 }
   0xa   :  { %357 = shalt.err (!%p354_p4)
}
   0xb   :  { %20 = dma.hbm_to_vmem [thread:$0]  %s453_s0, 128, %s18_s13, [#allocation3]  }
   0xc   :  { %s366_s19 = scalar_lea.vmem %s28_s15, 128  ;;  %p371_p6 = scmp.lt.s32.totalorder %s28_s15, %s28_s15 }
   0xd   :  { %p367_p5 = scmp.ne.s32.totalorder %s28_s15, %s366_s19  ;;  %p372_p7 = scmp.lt.s32.totalorder %s366_s19, %s366_s19 }
   0xf   :  { %p373_p8 = por %p372_p7, %p371_p6 }
  0x11   :  { %p374_p9 = pnand %p373_p8, %p367_p5 }
  0x13   :  { %377 = shalt.err (!%p374_p9)
}
  0x14   :  { %30 = dma.hbm_to_vmem [thread:$0]  %s454_s1, 128, %s28_s15, [#allocation5]  }
  0x15   :  { %378 = dma.done.wait [#allocation3], 128  }
  0x16   :  { %379 = vsyncadd [#allocation3], 4294967168 }
  0x17   :  { %380 = dma.done.wait [#allocation5], 128  }
  0x18   :  { %381 = vsyncadd [#allocation5], 4294967168  ;;  %v37_v0 = vld [vmem:[#allocation2] sm:$0xff]  ;;  %vm40_vm0 = vcmask 261120   ;;  %v38_v1 = vld [vmem:[#allocation4] sm:$0xff] }
  0x19   :  { %v45_v2 = vmul.f32 %v37_v0, %v37_v0  ;;  %v50_v3 = vmul.f32 %v38_v1, %v38_v1  ;;  %v39_v4 = vmul.f32 %v38_v1, %v37_v0  ;;  %v384_v28 = vmov 683565275  }
  0x1a   :  { %v385_v30 = vmov 2475754826   ;;  %v386_v33 = vmov 2131351028   ;;  %v387_v36 = vmov 2102212464  }
  0x1b   :  { %v46_v5 = vsel %vm40_vm0, %v45_v2, 0.0  ;;  %v41_v6 = vsel %vm40_vm0, %v39_v4, 0.0  ;;  %v51_v7 = vsel %vm40_vm0, %v50_v3, 0.0  ;;  %v388_v39 = vmov 920167782  }
  0x1c   :  { %47 = vadd.xlane.f32.xlu0 %v46_v5  ;;  %42 = vadd.xlane.f32.xlu1 %v41_v6  ;;  %v389_v42 = vmov 1326507024  }
  0x20   :  { %52 = vadd.xlane.f32.xlu0 %v51_v7 }
  0xa5   :  { %v48_v8 = vpop.xlane.xlu0 %47  ;;  %v43_v13 = vpop.xlane.xlu1 %42 }
  0xa6   :  { %v55_v9 = vmax.f32 %v48_v8, 1e-24 }
  0xa8   :  { %328 = vrsqrt.f32 %v55_v9 }
  0xa9   :  { %v53_v10 = vpop.xlane.xlu0 %52 }
  0xaa   :  { %v57_v11 = vmax.f32 %v53_v10, 1e-24 }
  0xac   :  { %330 = vrsqrt.f32 %v57_v11 }
  0xb5   :  { %v329_v12 = vpop.eup %328 }
  0xb6   :  { %v59_v14 = vmul.f32 %v329_v12, %v43_v13 }
  0xb9   :  { %v331_v15 = vpop.eup %330 }
  0xba   :  { %v416_v16 = vmul.f32 %v331_v15, %v59_v14 }
  0xbc   :  { %v419_v17 = vmul.f32 -0.5, %v416_v16 }
  0xbe   :  { %v76_v18 = vand.u32 2139095040, %v419_v17  ;;  %v73_v22 = vand.u32 2147483647, %v419_v17  ;;  %vm75_vm8 = vcmp.lt.s32.totalorder %v419_v17, 0 }
  0xc0   :  { %v77_v19 = vshrl.u32 %v76_v18, 23  ;;  %v80_v25 = vand.u32 8388607, %v73_v22  ;;  %v435_v18 = vclamps-f32 %v416_v16, 0.9999999 }
  0xc1   :  { %vm74_vm9 = vcmp.le.f32.partialorder %v73_v22, 0.7853982 }
  0xc2   :  { %v308_v20 = vadd.s32 4294967169, %v77_v19  ;;  %v81_v44 = vor.u32 8388608, %v80_v25 }
  0xc4   :  { %v83_v21 = vadd.s32 1, %v308_v20  ;;  %v121_v58 = vshll.u32 %v81_v44, 8 }
  0xc6   :  { %vm84_vm1 = vcmp.gt.s32.totalorder %v83_v21, 0 }
  0xc7   :  { %v85_v23 = vsel %vm84_vm1, %v83_v21, 0 }
  0xc8   :  { %v87_v24 = vand.u32 31, %v85_v23  ;;  %v86_v27 = vshrl.u32 %v85_v23, 5 }
  0xca   :  { %v88_v26 = vsub.s32 32, %v87_v24  ;;  %v90_v29 = vshll.u32 %v384_v28, %v87_v24  ;;  %v93_v31 = vshll.u32 %v385_v30, %v87_v24  ;;  %v96_v35 = vshll.u32 %v386_v33, %v87_v24 }
  0xcb   :  { %v99_v38 = vshll.u32 %v387_v36, %v87_v24  ;;  %v102_v41 = vshll.u32 %v388_v39, %v87_v24  ;;  %vm105_vm2 = vcmp.lt.s32.totalorder %v86_v27, 1  ;;  %vm108_vm3 = vcmp.lt.s32.totalorder %v86_v27, 4 }
  0xcc   :  { %v91_v32 = vshrl.u32 %v385_v30, %v88_v26  ;;  %v94_v34 = vshrl.u32 %v386_v33, %v88_v26  ;;  %v97_v37 = vshrl.u32 %v387_v36, %v88_v26  ;;  %v100_v40 = vshrl.u32 %v388_v39, %v88_v26 }
  0xcd   :  { %v103_v43 = vshrl.u32 %v389_v42, %v88_v26  ;;  %v89_v53 = vshrl.u32 %v384_v28, %v88_v26  ;;  %vm107_vm4 = vcmp.lt.s32.totalorder %v86_v27, 3  ;;  %vm106_vm5 = vcmp.lt.s32.totalorder %v86_v27, 2 }
  0xce   :  { %v92_v45 = vor.u32 %v91_v32, %v90_v29  ;;  %v95_v46 = vor.u32 %v94_v34, %v93_v31  ;;  %v98_v47 = vor.u32 %v97_v37, %v96_v35  ;;  %v101_v48 = vor.u32 %v100_v40, %v99_v38 }
  0xcf   :  { %v104_v49 = vor.u32 %v103_v43, %v102_v41  ;;  %v63_v27 = vmul.f32 %v435_v18, %v435_v18 }
  0xd0   :  { %v110_v50 = vsel %vm108_vm3, %v98_v47, 2102212464  ;;  %v113_v51 = vsel %vm105_vm2, %v92_v45, %v95_v46  ;;  %v117_v52 = vsel %vm105_vm2, %v95_v46, %v98_v47  ;;  %v114_v54 = vsel %vm108_vm3, %v101_v48, 920167782 }
  0xd1   :  { %v118_v55 = vsel %vm108_vm3, %v104_v49, 1326507024  ;;  %v115_v56 = vsel %vm107_vm4, %v98_v47, %v114_v54  ;;  %v109_v59 = vsel %vm105_vm2, %v89_v53, %v92_v45  ;;  %v111_v60 = vsel %vm107_vm4, %v95_v46, %v110_v50 }
  0xd2   :  { %v119_v57 = vsel %vm107_vm4, %v101_v48, %v118_v55  ;;  %v116_v61 = vsel %vm106_vm5, %v113_v51, %v115_v56  ;;  %v112_v3 = vsel %vm106_vm5, %v109_v59, %v111_v60  ;;  %v64_v31 = vsub.f32 1.0, %v63_v27 }
  0xd3   :  { %v120_v62 = vsel %vm106_vm5, %v117_v52, %v119_v57  ;;  %v428_v1 = vmul.u32.u64.low %v121_v58, %v116_v61  ;;  %v429_v2 = vmul.u32.u64.high %v121_v58, %v116_v61, %v428_v1  ;;  %v128_v5 = vmul.u32 %v121_v58, %v112_v3 }
  0xd4   :  { %v425_v63 = vmul.u32.u64.low %v121_v58, %v120_v62  ;;  %v426_v0 = vmul.u32.u64.high %v121_v58, %v120_v62, %v425_v63  ;;  %332 = vrsqrt.f32 %v64_v31  ;;  %vm67_vm10 = vcmp.eq.f32.partialorder %v64_v31, inf }
  0xd5   :  { %v131_v4 = vadd.s32 1, %v429_v2  ;;  %v70_v47 = vand.u32 2147483648, %v64_v31  ;;  %vm69_vm1 = vcmp.eq.f32.partialorder %v64_v31, 0.0  ;;  %vm165_vm2 = vweird.f32 %v419_v17 }
  0xd6   :  { %vm130_vm6 = vc.u32 %v426_v0, %v428_v1  ;;  %v129_v20 = vadd.s32 %v428_v1, %v426_v0  ;;  %vm290_vm3 = vcmask 7168  }
  0xd7   :  { %v132_v6 = vsel %vm130_vm6, %v131_v4, %v429_v2 }
  0xd8   :  { %v133_v7 = vadd.s32 %v132_v6, %v128_v5 }
  0xda   :  { %v134_v8 = vadd.s32 536870912, %v133_v7 }
  0xdc   :  { %v135_v9 = vshrl.u32 %v134_v8, 30 }
  0xde   :  { %v136_v10 = vshll.u32 %v135_v9, 30  ;;  %v159_v35 = vsub.s32 4, %v135_v9 }
  0xe0   :  { %v137_v11 = vsub.s32 %v133_v7, %v136_v10  ;;  %v160_v38 = vsel %vm75_vm8, %v159_v35, %v135_v9 }
  0xe1   :  { %v162_v39 = vsel %vm74_vm9, 0, %v160_v38  ;;  %v333_v41 = vpop.eup %332 }
  0xe2   :  { %v139_v12 = vsub.s32 0, %v137_v11  ;;  %v269_v40 = vadd.s32 3, %v162_v39  ;;  %v66_v42 = vmul.f32 %v333_v41, %v64_v31  ;;  %v166_v43 = vand.u32 3, %v162_v39 }
  0xe4   :  { %v309_v13 = vmin.u32 %v139_v12, %v137_v11  ;;  %v270_v44 = vand.u32 3, %v269_v40  ;;  %v68_v49 = vsel %vm67_vm10, %v64_v31, %v66_v42  ;;  %vm171_vm11 = vcmp.eq.s32.totalorder %v166_v43, 2 }
  0xe5   :  { %vm168_vm13 = vcmp.eq.s32.totalorder %v166_v43, 0  ;;  %vm167_vm15 = vcmp.lt.s32.totalorder %v166_v43, 2  ;;  %v71_v56 = vsel %vm69_vm1, %v70_v47, %v68_v49 }
  0xe6   :  { %v141_v14 = vclz %v309_v13  ;;  %vm275_vm12 = vcmp.eq.s32.totalorder %v270_v44, 2  ;;  %vm272_vm14 = vcmp.eq.s32.totalorder %v270_v44, 0  ;;  %vm271_vm0 = vcmp.lt.s32.totalorder %v270_v44, 2 }
  0xe8   :  { %v310_v15 = vadd.s32 4294967294, %v141_v14 }
  0xea   :  { %vm311_vm7 = vcmp.lt.s32.totalorder %v310_v15, 0 }
  0xeb   :  { %v144_v19 = vsel %vm311_vm7, 0, %v310_v15 }
  0xec   :  { %v145_v21 = vsub.s32 32, %v144_v19  ;;  %v149_v23 = vsub.s32 4294967266, %v144_v19  ;;  %v146_v24 = vshll.u32 %v137_v11, %v144_v19 }
  0xee   :  { %v147_v25 = vshrl.u32 %v129_v20, %v145_v21  ;;  %v150_v26 = vadd.s32 127, %v149_v23 }
  0xf0   :  { %v148_v28 = vor.u32 %v147_v25, %v146_v24  ;;  %v151_v29 = vshll.u32 %v150_v26, 23 }
  0xf2   :  { %v152_v30 = vor.u32 4788187, %v151_v29  ;;  %v155_v33 = vcvt.s32.f32 %v148_v28 }
  0xf4   :  { %v153_v32 = vand.u32 2147483647, %v152_v30 }
  0xf6   :  { %v156_v34 = vmul.f32 %v155_v33, %v153_v32 }
  0xf8   :  { %v157_v16 = vxor.u32 2147483648, %v156_v34 }
  0xfa   :  { %v158_v36 = vsel %vm75_vm8, %v157_v16, %v156_v34 }
  0xfb   :  { %v161_v37 = vsel %vm74_vm9, %v419_v17, %v158_v36 }
  0xfc   :  { %334 = vcosq.f32 %v161_v37 }
  0xfd   :  { %336 = vsinq.f32 %v161_v37 }
 0x109   :  { %v335_v45 = vpop.eup %334 }
 0x10a   :  { %v337_v46 = vpop.eup %336  ;;  %v172_v48 = vxor.u32 2147483648, %v335_v45 }
 0x10b   :  { %v169_v50 = vxor.u32 2147483648, %v337_v46 }
 0x10c   :  { %v173_v22 = vsel %vm171_vm11, %v172_v48, %v337_v46  ;;  %v277_v51 = vsel %vm275_vm12, %v172_v48, %v337_v46 }
 0x10d   :  { %v170_v52 = vsel %vm168_vm13, %v335_v45, %v169_v50  ;;  %v274_v53 = vsel %vm272_vm14, %v335_v45, %v169_v50 }
 0x10e   :  { %v174_v54 = vsel %vm167_vm15, %v170_v52, %v173_v22  ;;  %v278_v55 = vsel %vm271_vm0, %v274_v53, %v277_v51 }
 0x10f   :  { %v175_v57 = vsel %vm165_vm2, nan, %v174_v54  ;;  %v279_v58 = vsel %vm165_vm2, nan, %v278_v55 }
 0x110   :  { %v280_v59 = vmul.f32 0.87758255, %v175_v57  ;;  %v281_v60 = vmul.f32 0.47942555, %v279_v58  ;;  %v283_v61 = vmul.f32 0.87758255, %v279_v58  ;;  %v286_v62 = vmul.f32 %v435_v18, %v175_v57 }
 0x111   :  { %v284_v63 = vmul.f32 0.47942555, %v175_v57  ;;  %v287_v0 = vmul.f32 %v279_v58, %v71_v56 }
 0x112   :  { %v282_v1 = vsub.f32 %v280_v59, %v281_v60 }
 0x113   :  { %v285_v2 = vadd.f32 %v284_v63, %v283_v61  ;;  %v288_v3 = vsub.f32 %v286_v62, %v287_v0 }
 0x114   :  { %v292_v4 = vmul.f32 %v435_v18, %v282_v1 }
 0x115   :  { %v289_v5 = vmul.f32 64.0, %v288_v3  ;;  %v293_v17 = vmul.f32 %v285_v2, %v71_v56 }
 0x117   :  { %291 = vst.msk [vmem:[%s455_s2] sm:$0xff] %vm290_vm3, %v289_v5  ;;  %v294_v6 = vsub.f32 %v292_v4, %v293_v17 }
 0x119   :  { %v295_v7 = vmul.f32 64.0, %v294_v6 }
 0x11b   :  { %296 = vst.msk [vmem:[%s456_s3] sm:$0xff] %vm290_vm3, %v295_v7 }
 0x11c   :  { %305 = vsyncpa [#allocation3], 1 }
 0x11d   :  { %306 = vsyncpa [#allocation5], 1 }

</bundles_post_ra>
